<compile_context>
chip_gen: v7x
topology: tpu7x:2x2x1
jax: 0.10.0
libtpu: 0.0.40
codegen_flags: <defaults>
</compile_context>

<pallas_src>
import functools

import jax
import jax.numpy as jnp
from jax.experimental import pallas as pl
from jax.experimental.pallas import tpu as pltpu


# ---------------------------------------------------------------------------
# Default parameters (norse LIFRefracParameters / LIFParameters defaults).
# ---------------------------------------------------------------------------
TAU_SYN_INV = 1.0 / 5e-3     # 200.0
TAU_MEM_INV = 1.0 / 1e-2     # 100.0
V_LEAK = 0.0
V_TH = 1.0
V_RESET = 0.0
RHO_RESET = 5.0
DT = 0.001

_LANES = 128
_SPLIT_ROWS = 256                 # force >=2 blocks above this when multi-core
_WHOLE_ARRAY_BUDGET = 8 << 20     # VMEM budget for the zero-copy ragged path


def _round_up(x, m):
    return -(-x // m) * m


@functools.lru_cache(maxsize=None)
def _vmem_capacity_bytes():
    """Physical VMEM per TensorCore; conservative default if query fails."""
    try:
        return int(pltpu.get_tpu_info().vmem_capacity_bytes)
    except Exception:
        return 64 << 20           # v7x-sized (smallest of v5e/v6e/v7x)


@functools.lru_cache(maxsize=None)
def _num_tensorcores():
    """Best-effort TensorCore count (v7x has 2 per chip); default 1."""
    try:
        info = pltpu.get_tpu_info()
        for attr in ("num_cores", "core_count", "num_tensorcores"):
            val = getattr(info, attr, None)
            if isinstance(val, int) and val > 0:
                return val
    except Exception:
        pass
    try:
        val = getattr(jax.devices()[0], "num_cores", None)
        if isinstance(val, int) and val > 0:
            return val
    except Exception:
        pass
    return 1


def _max_block_rows(itemsize):
    """Biggest (rows,128) block st. 8 streams x 2 buffers fit the VMEM budget."""
    budget = min(_vmem_capacity_bytes() // 2, 48 << 20)
    per_row = 16 * _LANES * itemsize          # 8 streams, double-buffered
    sub = max(8, 32 // itemsize)
    return max(sub, (budget // per_row) // sub * sub)


def _pick_block_rows(rows, itemsize):
    sub = max(8, 32 // itemsize)
    max_rows = _max_block_rows(itemsize)
    if rows > max_rows:
        return max_rows
    cores = _num_tensorcores()
    if cores > 1 and rows >= _SPLIT_ROWS:
        # >=2 grid blocks so the "parallel" axis shards across TensorCores.
        return min(max_rows, _round_up(-(-rows // cores), sub))
    return rows                                # single full-array block


def _fold_params(dt):
    return dict(
        c_mem=float(dt * TAU_MEM_INV),
        syn_decay=float(1.0 - dt * TAU_SYN_INV),
        v_leak=float(V_LEAK),
        v_th=float(V_TH),
        v_reset=float(V_RESET),
        rho_reset=float(RHO_RESET),
    )


# ---------------------------------------------------------------------------
# Kernel bodies.
# ---------------------------------------------------------------------------
def _lif_refrac_update(x, v, i, rho, *, c_mem, syn_decay, v_leak, v_th,
                       v_reset, rho_reset):
    """One Euler step on arbitrary-shaped VMEM values (constants folded)."""
    dtype = x.dtype
    v_decayed = v + c_mem * ((v_leak - v) + i)
    i_decayed = i * syn_decay

    spike = v_decayed > v_th          # heaviside(v_decayed - v_th)
    refrac = rho > 0                  # heaviside(rho)
    refrac_f = refrac.astype(dtype)

    v_new = jnp.where(spike, v_reset, v_decayed)
    v_new = jnp.where(refrac, v, v_new)            # frozen while refractory
    i_new = i_decayed + x
    rho_new = jnp.where(spike, rho_reset, jnp.maximum(rho - refrac_f, 0.0))
    return spike.astype(dtype), v_new, i_new, rho_new


def _step_kernel(x_ref, v_ref, i_ref, rho_ref,
                 z_out, v_out, i_out, rho_out, **p):
    z, v, i, rho = _lif_refrac_update(
        x_ref[...], v_ref[...], i_ref[...], rho_ref[...], **p)
    z_out[...] = z
    v_out[...] = v
    i_out[...] = i
    rho_out[...] = rho


def _seq_kernel(x_ref, v_ref, i_ref, rho_ref,
                z_ref, v_out, i_out, rho_out, **p):
    """Fused T-step kernel; state lives in the (VMEM-resident) output blocks."""
    @pl.when(pl.program_id(1) == 0)
    def _():
        v_out[...] = v_ref[...]
        i_out[...] = i_ref[...]
        rho_out[...] = rho_ref[...]

    z, v, i, rho = _lif_refrac_update(
        x_ref[0], v_out[...], i_out[...], rho_out[...], **p)
    z_ref[0] = z
    v_out[...] = v
    i_out[...] = i
    rho_out[...] = rho


# ---------------------------------------------------------------------------
# pallas_call wrappers.
# ---------------------------------------------------------------------------
def _call_step_on_slab(kernel, args, rows, itemsize, dtype):
    """Run the 4-in/4-out step kernel on (rows, 128) slabs with big tiles."""
    block_rows = _pick_block_rows(rows, itemsize)
    grid = (pl.cdiv(rows, block_rows),)
    blk = pl.BlockSpec((block_rows, _LANES), lambda r: (r, 0))
    sds = jax.ShapeDtypeStruct((rows, _LANES), dtype)
    n = rows * _LANES
    vmem_limit = 16 * block_rows * _LANES * itemsize + (8 << 20)
    return pl.pallas_call(
        kernel,
        out_shape=(sds, sds, sds, sds),
        grid=grid,
        in_specs=[blk, blk, blk, blk],
        out_specs=(blk, blk, blk, blk),
        input_output_aliases={1: 1, 2: 2, 3: 3},    # v, i, rho update in place
        compiler_params=pltpu.CompilerParams(
            dimension_semantics=("parallel",),
            vmem_limit_bytes=vmem_limit),
        cost_estimate=pl.CostEstimate(
            flops=12 * n, transcendentals=0,
            bytes_accessed=8 * n * itemsize),
    )(*args)


def lif_refrac_feed_forward_step(x, v, i, rho, dt=DT):
    """One Euler step of the LIF neuron with absolute refractory period.

    x, v, i, rho share shape/dtype.  Returns (z, (v', i'), rho').
    """
    orig_shape = x.shape
    dtype = x.dtype
    itemsize = jnp.dtype(dtype).itemsize
    n = x.size
    kernel = functools.partial(_step_kernel, **_fold_params(dt))

    if n == 0:
        return jnp.zeros(orig_shape, dtype), (v, i), rho

    # ---- Fast path: lane-dense (rows, 128) slab, free reshape. ----
    if n % _LANES == 0 and n >= _LANES:
        rows = n // _LANES
        args = tuple(a.reshape(rows, _LANES) for a in (x, v, i, rho))
        z, v_new, i_new, rho_new = _call_step_on_slab(
            kernel, args, rows, itemsize, dtype)
        rs = lambda a: a.reshape(orig_shape)
        return rs(z), (rs(v_new), rs(i_new)), rs(rho_new)

    # ---- Small ragged shapes: whole array as one VMEM block, zero copies. ----
    if len(orig_shape) >= 2:
        view = (n // orig_shape[-1], orig_shape[-1])    # merge leading dims (free)
    else:
        view = (1, n)
    sub = max(8, 32 // itemsize)
    padded_bytes = (_round_up(view[0], sub) * _round_up(view[1], _LANES)
                    * itemsize)
    if 16 * padded_bytes <= _WHOLE_ARRAY_BUDGET:
        sds = jax.ShapeDtypeStruct(view, dtype)
        args = tuple(a.reshape(view) for a in (x, v, i, rho))
        z, v_new, i_new, rho_new = pl.pallas_call(
            kernel,
            out_shape=(sds, sds, sds, sds),
            input_output_aliases={1: 1, 2: 2, 3: 3},
        )(*args)
        rs = lambda a: a.reshape(orig_shape)
        return rs(z), (rs(v_new), rs(i_new)), rs(rho_new)

    # ---- Large ragged shapes: pad the <128-element tail to a slab. ----
    # TODO(synk): a masked boundary block on an unpadded 1-D layout would
    # avoid the pad/slice round trip for large non-128-multiple shapes.
    rows = pl.cdiv(n, _LANES)
    slab_n = rows * _LANES

    def to_slab(a):
        flat = a.reshape(-1)
        return jnp.pad(flat, (0, slab_n - n)).reshape(rows, _LANES)

    args = tuple(to_slab(a) for a in (x, v, i, rho))
    z, v_new, i_new, rho_new = _call_step_on_slab(
        kernel, args, rows, itemsize, dtype)

    def unslab(a):
        return a.reshape(-1)[:n].reshape(orig_shape)

    return unslab(z), (unslab(v_new), unslab(i_new)), unslab(rho_new)


def lif_refrac_feed_forward_sequence(xs, v, i, rho, dt=DT):
    """Fused multi-step integration.  xs: (T, *state_shape).

    Keeps v/i/rho resident in VMEM across the time axis (~4x less HBM traffic
    than T single-step calls).  Returns (zs, (v', i'), rho').
    """
    T = xs.shape[0]
    state_shape = xs.shape[1:]
    dtype = xs.dtype
    itemsize = jnp.dtype(dtype).itemsize
    n = v.size

    if T == 0:
        return jnp.zeros_like(xs), (v, i), rho

    if n % _LANES != 0 or n < _LANES:
        # Ragged state: fall back to looping single steps (semantics identical).
        zs = []
        for t in range(T):
            z, (v, i), rho = lif_refrac_feed_forward_step(xs[t], v, i, rho, dt=dt)
            zs.append(z)
        return jnp.stack(zs), (v, i), rho

    rows = n // _LANES
    block_rows = _pick_block_rows(rows, itemsize)
    row_blocks = pl.cdiv(rows, block_rows)

    kernel = functools.partial(_seq_kernel, **_fold_params(dt))
    xs2 = xs.reshape(T, rows, _LANES)
    v2, i2, rho2 = (a.reshape(rows, _LANES) for a in (v, i, rho))

    x_blk = pl.BlockSpec((1, block_rows, _LANES), lambda r, t: (t, r, 0))
    s_blk = pl.BlockSpec((block_rows, _LANES), lambda r, t: (r, 0))
    seq_sds = jax.ShapeDtypeStruct((T, rows, _LANES), dtype)
    st_sds = jax.ShapeDtypeStruct((rows, _LANES), dtype)
    vmem_limit = 16 * block_rows * _LANES * itemsize + (8 << 20)

    zs, v_new, i_new, rho_new = pl.pallas_call(
        kernel,
        out_shape=(seq_sds, st_sds, st_sds, st_sds),
        grid=(row_blocks, T),
        in_specs=[x_blk, s_blk, s_blk, s_blk],
        out_specs=(x_blk, s_blk, s_blk, s_blk),
        input_output_aliases={1: 1, 2: 2, 3: 3},
        compiler_params=pltpu.CompilerParams(
            dimension_semantics=("parallel", "arbitrary"),
            vmem_limit_bytes=vmem_limit),
        cost_estimate=pl.CostEstimate(
            flops=12 * n * T, transcendentals=0,
            bytes_accessed=(2 * T + 6) * n * itemsize),
    )(xs2, v2, i2, rho2)

    return (zs.reshape(xs.shape),
            (v_new.reshape(state_shape), i_new.reshape(state_shape)),
            rho_new.reshape(state_shape))


class LIFRefracFeedForwardCell:
    """JAX/Pallas port of norse.torch.module.lif_refrac.LIFRefracFeedForwardCell."""

    def __init__(self, dt: float = DT):
        self.dt = dt

    def __call__(self, input_tensor, state=None):
        if state is None:
            v = jnp.full(input_tensor.shape, V_LEAK, dtype=input_tensor.dtype)
            i = jnp.zeros_like(input_tensor)
            rho = jnp.zeros_like(input_tensor)
        else:
            (v, i), rho = state
        z, (v_new, i_new), rho_new = lif_refrac_feed_forward_step(
            input_tensor, v, i, rho, dt=self.dt)
        return z, ((v_new, i_new), rho_new)


# ---------------------------------------------------------------------------
# Pure-JAX reference for verification (original norse formulation).
# ---------------------------------------------------------------------------
def _reference_step(x, v, i, rho, dt=DT):
    dv = dt * TAU_MEM_INV * ((V_LEAK - v) + i)
    v_decayed = v + dv
    i_decayed = i - dt * TAU_SYN_INV * i
    z = (v_decayed - V_TH > 0).astype(x.dtype)
    v_new = (1 - z) * v_decayed + z * V_RESET
    i_new = i_decayed + x
    refrac = (rho > 0).astype(x.dtype)
    v_new = (1 - refrac) * v_new + refrac * v
    rho_new = (1 - z) * jnp.maximum(rho - refrac, 0.0) + z * RHO_RESET
    return z, v_new, i_new, rho_new


def _reference_sequence(xs, v, i, rho, dt=DT):
    zs = []
    for t in range(xs.shape[0]):
        z, v, i, rho = _reference_step(xs[t], v, i, rho, dt)
        zs.append(z)
    return jnp.stack(zs), v, i, rho


def _check(got, want, name):
    assert jnp.allclose(got, want, atol=1e-5, rtol=1e-5), f"mismatch in {name}"


if __name__ == "__main__":
    key = jax.random.PRNGKey(0)
    ks = jax.random.split(key, 16)
    cell = LIFRefracFeedForwardCell()

    # Case 1/2: module example shape (batch, 20, 30) -> ragged, zero-copy
    # whole-array path; default state and explicit state.
    x = jax.random.normal(ks[0], (2, 20, 30), dtype=jnp.float32)
    v = jax.random.normal(ks[1], x.shape, dtype=jnp.float32) * 2.0
    i = jax.random.normal(ks[2], x.shape, dtype=jnp.float32)
    rho = jnp.abs(jax.random.normal(ks[3], x.shape, dtype=jnp.float32)) * 3.0

    # Case 3: 128-multiple element count -> lane-dense slab path (big blocks).
    xb = jax.random.normal(ks[4], (4, 256, 512), dtype=jnp.float32)
    vb = jax.random.normal(ks[5], xb.shape, dtype=jnp.float32) * 2.0
    ib = jax.random.normal(ks[6], xb.shape, dtype=jnp.float32)
    rb = jnp.abs(jax.random.normal(ks[7], xb.shape, dtype=jnp.float32)) * 3.0

    # Case 4: larger ragged shape -> padded-slab fallback path.
    xc = jax.random.normal(ks[8], (4, 1250, 3), dtype=jnp.float32)
    vc = jax.random.normal(ks[9], xc.shape, dtype=jnp.float32) * 2.0
    ic = jax.random.normal(ks[10], xc.shape, dtype=jnp.float32)
    rc = jnp.abs(jax.random.normal(ks[11], xc.shape, dtype=jnp.float32)) * 3.0

    # Case 5: fused T-step sequence kernel (state resident in VMEM over T).
    T = 6
    xs = jax.random.normal(ks[12], (T, 2, 8, 128), dtype=jnp.float32)
    vs0 = jax.random.normal(ks[13], (2, 8, 128), dtype=jnp.float32) * 2.0
    is0 = jax.random.normal(ks[14], (2, 8, 128), dtype=jnp.float32)
    rs0 = jnp.abs(jax.random.normal(ks[15], (2, 8, 128), dtype=jnp.float32)) * 3.0

    # References (pure JAX).
    z2_r, v2_r, i2_r, rho2_r = _reference_step(x, v, i, rho)
    z3_r, v3_r, i3_r, rho3_r = _reference_step(xb, vb, ib, rb)
    z4_r, v4_r, i4_r, rho4_r = _reference_step(xc, vc, ic, rc)
    zs_r, vS_r, iS_r, rhoS_r = _reference_sequence(xs, vs0, is0, rs0)

    # Run the Pallas kernels.
    z1, ((v1, i1), rho1) = cell(x)                          # default state
    z2, ((v2, i2), rho2) = cell(x, state=((v, i), rho))     # whole-array path
    z3, ((v3, i3), rho3) = cell(xb, state=((vb, ib), rb))   # slab path
    z4, ((v4, i4), rho4) = cell(xc, state=((vc, ic), rc))   # padded fallback
    zs, (vS, iS), rhoS = lif_refrac_feed_forward_sequence(xs, vs0, is0, rs0)
    jax.block_until_ready((z1, v1, i1, rho1, z2, v2, i2, rho2,
                           z3, v3, i3, rho3, z4, v4, i4, rho4,
                           zs, vS, iS, rhoS))

    # Default-state step: no spikes, membrane stays at leak, i' = input, rho' = 0.
    _check(z1, jnp.zeros_like(x), "z1")
    _check(v1, jnp.zeros_like(x), "v1")
    _check(i1, x, "i1")
    _check(rho1, jnp.zeros_like(x), "rho1")

    _check(z2, z2_r, "z2"); _check(v2, v2_r, "v2")
    _check(i2, i2_r, "i2"); _check(rho2, rho2_r, "rho2")

    _check(z3, z3_r, "z3"); _check(v3, v3_r, "v3")
    _check(i3, i3_r, "i3"); _check(rho3, rho3_r, "rho3")

    _check(z4, z4_r, "z4"); _check(v4, v4_r, "v4")
    _check(i4, i4_r, "i4"); _check(rho4, rho4_r, "rho4")

    _check(zs, zs_r, "zs"); _check(vS, vS_r, "vS")
    _check(iS, iS_r, "iS"); _check(rhoS, rhoS_r, "rhoS")

    print("KERNEL_OK")
</pallas_src>

<mosaic_0001>
module attributes {stable_mosaic.version = 11 : i64} {
  func.func @_step_kernel(%arg0: memref<40x30xf32, #tpu.memory_space<vmem>>, %arg1: memref<40x30xf32, #tpu.memory_space<vmem>>, %arg2: memref<40x30xf32, #tpu.memory_space<vmem>>, %arg3: memref<40x30xf32, #tpu.memory_space<vmem>>, %arg4: memref<40x30xf32, #tpu.memory_space<vmem>>, %arg5: memref<40x30xf32, #tpu.memory_space<vmem>>, %arg6: memref<40x30xf32, #tpu.memory_space<vmem>>, %arg7: memref<40x30xf32, #tpu.memory_space<vmem>>) attributes {dimension_semantics = [], scalar_prefetch = 0 : i64, scratch_operands = 0 : i64, tpu.core_type = #tpu.core_type<tc>} {
    %c0 = arith.constant 0 : index
    %c0_0 = arith.constant 0 : index
    %0 = vector.load %arg0[%c0, %c0_0] : memref<40x30xf32, #tpu.memory_space<vmem>>, vector<40x30xf32>
    %c0_1 = arith.constant 0 : index
    %c0_2 = arith.constant 0 : index
    %1 = vector.load %arg1[%c0_1, %c0_2] : memref<40x30xf32, #tpu.memory_space<vmem>>, vector<40x30xf32>
    %c0_3 = arith.constant 0 : index
    %c0_4 = arith.constant 0 : index
    %2 = vector.load %arg2[%c0_3, %c0_4] : memref<40x30xf32, #tpu.memory_space<vmem>>, vector<40x30xf32>
    %c0_5 = arith.constant 0 : index
    %c0_6 = arith.constant 0 : index
    %3 = vector.load %arg3[%c0_5, %c0_6] : memref<40x30xf32, #tpu.memory_space<vmem>>, vector<40x30xf32>
    %cst = arith.constant 0.000000e+00 : f32
    %4 = vector.broadcast %cst : f32 to vector<40x30xf32>
    %5 = arith.subf %4, %1 : vector<40x30xf32>
    %6 = arith.addf %5, %2 : vector<40x30xf32>
    %cst_7 = arith.constant 1.000000e-01 : f32
    %7 = vector.broadcast %cst_7 : f32 to vector<40x30xf32>
    %8 = arith.mulf %7, %6 : vector<40x30xf32>
    %9 = arith.addf %1, %8 : vector<40x30xf32>
    %cst_8 = arith.constant 8.000000e-01 : f32
    %10 = vector.broadcast %cst_8 : f32 to vector<40x30xf32>
    %11 = arith.mulf %2, %10 : vector<40x30xf32>
    %cst_9 = arith.constant 1.000000e+00 : f32
    %12 = vector.broadcast %cst_9 : f32 to vector<40x30xf32>
    %13 = arith.cmpf ogt, %9, %12 : vector<40x30xf32>
    %cst_10 = arith.constant 0.000000e+00 : f32
    %14 = vector.broadcast %cst_10 : f32 to vector<40x30xf32>
    %15 = arith.cmpf ogt, %3, %14 : vector<40x30xf32>
    %16 = arith.extui %15 : vector<40x30xi1> to vector<40x30xi32>
    %17 = arith.sitofp %16 : vector<40x30xi32> to vector<40x30xf32>
    %cst_11 = arith.constant 0.000000e+00 : f32
    %18 = vector.broadcast %cst_11 : f32 to vector<40x30xf32>
    %19 = arith.select %13, %18, %9 : vector<40x30xi1>, vector<40x30xf32>
    %20 = arith.select %15, %1, %19 : vector<40x30xi1>, vector<40x30xf32>
    %21 = arith.addf %11, %0 : vector<40x30xf32>
    %22 = arith.subf %3, %17 : vector<40x30xf32>
    %cst_12 = arith.constant 0.000000e+00 : f32
    %23 = vector.broadcast %cst_12 : f32 to vector<40x30xf32>
    %24 = arith.maximumf %22, %23 : vector<40x30xf32>
    %cst_13 = arith.constant 5.000000e+00 : f32
    %25 = vector.broadcast %cst_13 : f32 to vector<40x30xf32>
    %26 = arith.select %13, %25, %24 : vector<40x30xi1>, vector<40x30xf32>
    %27 = arith.extui %13 : vector<40x30xi1> to vector<40x30xi32>
    %28 = arith.sitofp %27 : vector<40x30xi32> to vector<40x30xf32>
    %c0_14 = arith.constant 0 : index
    %c0_15 = arith.constant 0 : index
    %29 = vector.load %arg4[%c0_14, %c0_15] : memref<40x30xf32, #tpu.memory_space<vmem>>, vector<40x30xf32>
    tpu.vector_store %arg4[%c0_14, %c0_15], %28 {strides = array<i32>} : memref<40x30xf32, #tpu.memory_space<vmem>>, vector<40x30xf32>,
    %c0_16 = arith.constant 0 : index
    %c0_17 = arith.constant 0 : index
    %30 = vector.load %arg5[%c0_16, %c0_17] : memref<40x30xf32, #tpu.memory_space<vmem>>, vector<40x30xf32>
    tpu.vector_store %arg5[%c0_16, %c0_17], %20 {strides = array<i32>} : memref<40x30xf32, #tpu.memory_space<vmem>>, vector<40x30xf32>,
    %c0_18 = arith.constant 0 : index
    %c0_19 = arith.constant 0 : index
    %31 = vector.load %arg6[%c0_18, %c0_19] : memref<40x30xf32, #tpu.memory_space<vmem>>, vector<40x30xf32>
    tpu.vector_store %arg6[%c0_18, %c0_19], %21 {strides = array<i32>} : memref<40x30xf32, #tpu.memory_space<vmem>>, vector<40x30xf32>,
    %c0_20 = arith.constant 0 : index
    %c0_21 = arith.constant 0 : index
    %32 = vector.load %arg7[%c0_20, %c0_21] : memref<40x30xf32, #tpu.memory_space<vmem>>, vector<40x30xf32>
    tpu.vector_store %arg7[%c0_20, %c0_21], %26 {strides = array<i32>} : memref<40x30xf32, #tpu.memory_space<vmem>>, vector<40x30xf32>,
    return
  }
}

</mosaic_0001>

<bundles_post_ra>
// kernel: tpu_custom_call.1
= control target key start
LH: loop header
LB: loop body
LE: loop exit
PB: predicated region body
PF: predicated region fallthrough
CT: control target
= control target key end

     0   :  { %vm126_vm0 = vcmask 244736   ;;  %v174_v29 = vmov 0.0   ;;  %s487_s1 = inlined_call_operand.vmem [shape: f32[40,30], index: 1, kind: input, shape index: {}, may-alias: {1,5}]   ;;  %s488_s2 = inlined_call_operand.vmem [shape: f32[40,30], index: 2, kind: input, shape index: {}, may-alias: {2,6}]   ;;  %s489_s3 = inlined_call_operand.vmem [shape: f32[40,30], index: 3, kind: input, shape index: {}, may-alias: {3,7}]   ;;  %s490_s4 = inlined_call_operand.vmem [shape: f32[40,30], index: 4, kind: output, shape index: {0}]   ;;  %s491_s0 = inlined_call_operand.vmem [shape: f32[40,30], index: 0, kind: input, shape index: {}]   ;;  %s492_s5 = inlined_call_operand.vmem [shape: f32[40,30], index: 5, kind: output, shape index: {1}, may-alias: {1,5}]   ;;  %s493_s6 = inlined_call_operand.vmem [shape: f32[40,30], index: 6, kind: output, shape index: {2}, may-alias: {2,6}]   ;;  %s494_s7 = inlined_call_operand.vmem [shape: f32[40,30], index: 7, kind: output, shape index: {3}, may-alias: {3,7}]  }
   0x1   :  { %v26_v0 = vld [vmem:[%s487_s1] sm:$0xff]  ;;  %v224_v2 = vld [vmem:[%s487_s1 + $0x8] sm:$0xff]  ;;  %v235_v6 = vld [vmem:[%s487_s1 + $0x10] sm:$0xff] }
   0x2   :  { %v31_v1 = vld [vmem:[%s488_s2] sm:$0xff]  ;;  %v41_v3 = vsub.f32 0.0, %v26_v0  ;;  %v229_v4 = vld [vmem:[%s488_s2 + $0x8] sm:$0xff]  ;;  %v42_v5 = vsub.f32 0.0, %v224_v2  ;;  %v240_v7 = vld [vmem:[%s488_s2 + $0x10] sm:$0xff]  ;;  %v43_v8 = vsub.f32 0.0, %v235_v6 }
   0x3   :  { %v246_v9 = vld [vmem:[%s487_s1 + $0x18] sm:$0xff]  ;;  %v256_v11 = vld [vmem:[%s487_s1 + $0x20] sm:$0xff]  ;;  %v274_v18 = vld [vmem:[%s489_s3 + $0x8] sm:$0xff]  ;;  %v61_v21 = vmul.f32 0.8, %v31_v1 }
   0x4   :  { %v251_v10 = vld [vmem:[%s488_s2 + $0x18] sm:$0xff]  ;;  %v46_v12 = vadd.f32 %v41_v3, %v31_v1  ;;  %v47_v13 = vadd.f32 %v42_v5, %v229_v4  ;;  %v44_v14 = vsub.f32 0.0, %v246_v9  ;;  %v263_v15 = vld [vmem:[%s488_s2 + $0x20] sm:$0xff]  ;;  %v45_v16 = vsub.f32 0.0, %v256_v11  ;;  %v282_v20 = vld [vmem:[%s489_s3 + $0x10] sm:$0xff] }
   0x5   :  { %v269_v17 = vld [vmem:[%s489_s3] sm:$0xff]  ;;  %v48_v19 = vadd.f32 %v43_v8, %v240_v7  ;;  %vm72_vm2 = vcmp.gt.f32.partialorder %v274_v18, 0.0  ;;  %v289_v26 = vld [vmem:[%s489_s3 + $0x18] sm:$0xff]  ;;  %vm73_vm3 = vcmp.gt.f32.partialorder %v282_v20, 0.0  ;;  %v22_v54 = vld [vmem:[%s491_s0 + $0x8] sm:$0xff] }
   0x6   :  { %vm71_vm1 = vcmp.gt.f32.partialorder %v269_v17, 0.0  ;;  %v51_v22 = vmul.f32 0.1, %v46_v12  ;;  %v52_v23 = vmul.f32 0.1, %v47_v13  ;;  %v49_v24 = vadd.f32 %v44_v14, %v251_v10  ;;  %v294_v27 = vld [vmem:[%s489_s3 + $0x20] sm:$0xff] }
   0x7   :  { %v50_v25 = vadd.f32 %v45_v16, %v263_v15  ;;  %v53_v28 = vmul.f32 0.1, %v48_v19  ;;  %v298_v30 = vsel %vm71_vm1, 1.0, %v174_v29  ;;  %v302_v31 = vsel %vm72_vm2, 1.0, %v174_v29  ;;  %v21_v45 = vld [vmem:[%s491_s0] sm:$0xff]  ;;  %v23_v59 = vld [vmem:[%s491_s0 + $0x10] sm:$0xff] }
   0x8   :  { %v305_v32 = vadd.f32 %v51_v22, %v26_v0  ;;  %v308_v33 = vadd.f32 %v52_v23, %v224_v2  ;;  %v54_v34 = vmul.f32 0.1, %v49_v24  ;;  %v165_v37 = vsel %vm73_vm3, 1.0, %v174_v29  ;;  %v24_v60 = vld [vmem:[%s491_s0 + $0x18] sm:$0xff]  ;;  %v25_v61 = vld [vmem:[%s491_s0 + $0x20] sm:$0xff] }
   0x9   :  { %v55_v35 = vmul.f32 0.1, %v50_v25  ;;  %v311_v36 = vadd.f32 %v53_v28, %v235_v6  ;;  %vm74_vm4 = vcmp.gt.f32.partialorder %v289_v26, 0.0  ;;  %vm75_vm5 = vcmp.gt.f32.partialorder %v294_v27, 0.0 }
   0xa   :  { %vm66_vm6 = vcmp.gt.f32.partialorder %v305_v32, 1.0  ;;  %vm67_vm7 = vcmp.gt.f32.partialorder %v308_v33, 1.0  ;;  %v320_v38 = vadd.f32 %v54_v34, %v246_v9  ;;  %v166_v52 = vsel %vm74_vm4, 1.0, %v174_v29 }
   0xb   :  { %v323_v39 = vadd.f32 %v55_v35, %v256_v11  ;;  %v168_v40 = vsel %vm66_vm6, 1.0, %v174_v29  ;;  %v169_v41 = vsel %vm67_vm7, 1.0, %v174_v29  ;;  %vm68_vm8 = vcmp.gt.f32.partialorder %v311_v36, 1.0 }
   0xc   :  { %v86_v42 = vsel %vm66_vm6, 0.0, %v305_v32  ;;  %127 = vst.msk [vmem:[%s490_s4] sm:$0xff] %vm126_vm0, %v168_v40  ;;  %128 = vst.msk [vmem:[%s490_s4 + $0x8] sm:$0xff] %vm126_vm0, %v169_v41  ;;  %v170_v43 = vsel %vm68_vm8, 1.0, %v174_v29  ;;  %vm69_vm9 = vcmp.gt.f32.partialorder %v320_v38, 1.0  ;;  %v87_v48 = vsel %vm67_vm7, 0.0, %v308_v33 }
   0xd   :  { %vm70_vm10 = vcmp.gt.f32.partialorder %v323_v39, 1.0  ;;  %v91_v44 = vsel %vm71_vm1, %v26_v0, %v86_v42  ;;  %129 = vst.msk [vmem:[%s490_s4 + $0x10] sm:$0xff] %vm126_vm0, %v170_v43  ;;  %v171_v46 = vsel %vm69_vm9, 1.0, %v174_v29  ;;  %v88_v49 = vsel %vm68_vm8, 0.0, %v311_v36 }
   0xe   :  { %v172_v47 = vsel %vm70_vm10, 1.0, %v174_v29  ;;  %132 = vst.msk [vmem:[%s492_s5] sm:$0xff] %vm126_vm0, %v91_v44  ;;  %130 = vst.msk [vmem:[%s490_s4 + $0x18] sm:$0xff] %vm126_vm0, %v171_v46  ;;  %v92_v50 = vsel %vm72_vm2, %v224_v2, %v87_v48  ;;  %v93_v51 = vsel %vm73_vm3, %v235_v6, %v88_v49  ;;  %v89_v53 = vsel %vm69_vm9, 0.0, %v320_v38 }
   0xf   :  { %131 = vst.msk [vmem:[%s490_s4 + $0x20] sm:$0xff] %vm126_vm0, %v172_v47  ;;  %133 = vst.msk [vmem:[%s492_s5 + $0x8] sm:$0xff] %vm126_vm0, %v92_v50  ;;  %v94_v55 = vsel %vm74_vm4, %v246_v9, %v89_v53  ;;  %v167_v56 = vsel %vm75_vm5, 1.0, %v174_v29  ;;  %v90_v57 = vsel %vm70_vm10, 0.0, %v323_v39  ;;  %v96_v58 = vadd.f32 %v61_v21, %v21_v45 }
  0x10   :  { %134 = vst.msk [vmem:[%s492_s5 + $0x10] sm:$0xff] %vm126_vm0, %v93_v51  ;;  %135 = vst.msk [vmem:[%s492_s5 + $0x18] sm:$0xff] %vm126_vm0, %v94_v55  ;;  %v95_v62 = vsel %vm75_vm5, %v256_v11, %v90_v57  ;;  %v62_v63 = vmul.f32 0.8, %v229_v4  ;;  %v63_v0 = vmul.f32 0.8, %v240_v7  ;;  %v101_v3 = vsub.f32 %v269_v17, %v298_v30 }
  0x11   :  { %v64_v1 = vmul.f32 0.8, %v251_v10  ;;  %136 = vst.msk [vmem:[%s492_s5 + $0x20] sm:$0xff] %vm126_vm0, %v95_v62  ;;  %137 = vst.msk [vmem:[%s493_s6] sm:$0xff] %vm126_vm0, %v96_v58  ;;  %v65_v2 = vmul.f32 0.8, %v263_v15  ;;  %v102_v4 = vsub.f32 %v274_v18, %v302_v31  ;;  %v103_v5 = vsub.f32 %v282_v20, %v165_v37 }
  0x12   :  { %v97_v6 = vadd.f32 %v62_v63, %v22_v54  ;;  %v98_v7 = vadd.f32 %v63_v0, %v23_v59  ;;  %v104_v9 = vsub.f32 %v289_v26, %v166_v52  ;;  %v106_v11 = vmax.f32 %v101_v3, 0.0 }
  0x13   :  { %v99_v8 = vadd.f32 %v64_v1, %v24_v60  ;;  %v100_v10 = vadd.f32 %v65_v2, %v25_v61  ;;  %v107_v12 = vmax.f32 %v102_v4, 0.0  ;;  %v108_v13 = vmax.f32 %v103_v5, 0.0 }
  0x14   :  { %138 = vst.msk [vmem:[%s493_s6 + $0x8] sm:$0xff] %vm126_vm0, %v97_v6  ;;  %139 = vst.msk [vmem:[%s493_s6 + $0x10] sm:$0xff] %vm126_vm0, %v98_v7  ;;  %v109_v14 = vmax.f32 %v104_v9, 0.0  ;;  %v105_v15 = vsub.f32 %v294_v27, %v167_v56  ;;  %v111_v16 = vsel %vm66_vm6, 5.0, %v106_v11 }
  0x15   :  { %140 = vst.msk [vmem:[%s493_s6 + $0x18] sm:$0xff] %vm126_vm0, %v99_v8  ;;  %141 = vst.msk [vmem:[%s493_s6 + $0x20] sm:$0xff] %vm126_vm0, %v100_v10  ;;  %v112_v17 = vsel %vm67_vm7, 5.0, %v107_v12  ;;  %v113_v18 = vsel %vm68_vm8, 5.0, %v108_v13 }
  0x16   :  { %142 = vst.msk [vmem:[%s494_s7] sm:$0xff] %vm126_vm0, %v111_v16  ;;  %143 = vst.msk [vmem:[%s494_s7 + $0x8] sm:$0xff] %vm126_vm0, %v112_v17  ;;  %v114_v19 = vsel %vm69_vm9, 5.0, %v109_v14  ;;  %v110_v20 = vmax.f32 %v105_v15, 0.0 }
  0x17   :  { %144 = vst.msk [vmem:[%s494_s7 + $0x10] sm:$0xff] %vm126_vm0, %v113_v18  ;;  %145 = vst.msk [vmem:[%s494_s7 + $0x18] sm:$0xff] %vm126_vm0, %v114_v19 }
  0x18   :  { %v115_v21 = vsel %vm70_vm10, 5.0, %v110_v20 }
  0x19   :  { %146 = vst.msk [vmem:[%s494_s7 + $0x20] sm:$0xff] %vm126_vm0, %v115_v21 }

</bundles_post_ra>
